<compile_context>
chip_gen: v7x
topology: tpu7x:2x2x1
jax: 0.10.0
libtpu: 0.0.40
codegen_flags: <defaults>
</compile_context>

<pallas_src>
import functools

import jax
import jax.numpy as jnp
from jax.experimental import pallas as pl
from jax.experimental.pallas import tpu as pltpu

NEG_SLOPE = 0.01  # PyTorch nn.LeakyReLU default negative_slope


def _round_up(x, m):
    return ((x + m - 1) // m) * m


def _leaky_relu(x):
    return jnp.where(x >= 0, x, NEG_SLOPE * x)


def _mlp_kernel(num_linear, tanh, matmul_dtype, x_ref, *refs):
    """refs = (w0, b0, w1, b1, ..., w_{L-1}, b_{L-1}, out_ref).

    Weights are (d_in_pad, d_out_pad), already transposed from PyTorch's
    (out,in) layout and cast to `matmul_dtype`; biases are (1, d_out_pad) f32.
    The whole MLP hot path (matmuls + LeakyReLU + Tanh) runs for one batch tile.
    """
    out_ref = refs[-1]
    params = refs[:-1]

    h = x_ref[...].astype(jnp.float32)
    for l in range(num_linear):
        w = params[2 * l][...]
        b = params[2 * l + 1][...].astype(jnp.float32)
        # MXU matmul: low-precision inputs, f32 accumulation; bias broadcast is
        # implicit (no explicit per-iteration broadcast_to).
        h = jnp.dot(h.astype(matmul_dtype), w,
                    preferred_element_type=jnp.float32) + b
        if l < num_linear - 1:  # LeakyReLU after every Linear but the last
            h = _leaky_relu(h)
    if tanh:
        h = jnp.tanh(h)
    out_ref[...] = h.astype(out_ref.dtype)


def _vmem_capacity_bytes():
    try:
        return int(pltpu.get_tpu_info().vmem_capacity_bytes)
    except Exception:
        return 64 * 1024 * 1024  # conservative: v7x per-TensorCore VMEM


def mlp_forward(x, weights, biases, *, tanh,
                matmul_dtype=jnp.bfloat16, max_block_batch=512):
    """Pallas MLP forward.

    x:        (B, in_size)
    weights:  list of PyTorch-layout matrices (out_features, in_features)
    biases:   list of (out_features,) vectors
    """
    B, in_size = x.shape
    num_linear = len(weights)
    out_size = int(weights[-1].shape[0])

    # ---- padded feature dims: every lane dim a multiple of 128 (lane-dense).
    dims = [in_size] + [int(w.shape[0]) for w in weights]
    dims_pad = [_round_up(d, 128) for d in dims]
    in_pad, out_pad = dims_pad[0], dims_pad[-1]

    # ---- glue: transpose to (in, out), zero-pad, cast weights to matmul dtype.
    wts, bs = [], []
    for l, (w, b) in enumerate(zip(weights, biases)):
        w = jnp.asarray(w, jnp.float32)
        b = jnp.asarray(b, jnp.float32)
        d_out, d_in = w.shape
        w_p = jnp.zeros((dims_pad[l], dims_pad[l + 1]), jnp.float32)
        w_p = w_p.at[:d_in, :d_out].set(w.T)
        wts.append(w_p.astype(matmul_dtype))
        b_p = jnp.zeros((1, dims_pad[l + 1]), jnp.float32).at[0, :d_out].set(b)
        bs.append(b_p)

    # ---- pick the batch tile: as large as possible within a VMEM budget.
    vmem_cap = _vmem_capacity_bytes()
    weight_bytes = sum(int(w.size) * w.dtype.itemsize for w in wts)
    weight_bytes += sum(int(b.size) * b.dtype.itemsize for b in bs)

    def vmem_est(bb):
        act = bb * (in_pad + out_pad) * 4 * 2     # pipelined x / out tiles
        inter = bb * max(dims_pad) * 4 * 4        # intermediates / spill headroom
        return 2 * weight_bytes + act + inter     # conservative: 2 weight buffers

    block_batch = min(_round_up(B, 8), _round_up(max_block_batch, 8))
    while block_batch > 8 and vmem_est(block_batch) > int(0.75 * vmem_cap):
        block_batch = max(8, _round_up(block_batch // 2, 8))

    b_pad_rows = _round_up(B, block_batch)
    x_p = jnp.zeros((b_pad_rows, in_pad), jnp.float32)
    x_p = x_p.at[:B, :in_size].set(jnp.asarray(x, jnp.float32))

    grid = (b_pad_rows // block_batch,)

    flops = 2 * b_pad_rows * sum(dims_pad[l] * dims_pad[l + 1]
                                 for l in range(num_linear))
    transcendentals = b_pad_rows * out_pad if tanh else 0
    bytes_accessed = int(x_p.size) * 4 + weight_bytes + b_pad_rows * out_pad * 4
    cost = pl.CostEstimate(flops=flops, transcendentals=transcendentals,
                           bytes_accessed=bytes_accessed)

    vmem_limit = int(min(vmem_cap,
                         max(2 * vmem_est(block_batch), 16 * 1024 * 1024)))

    kernel = functools.partial(_mlp_kernel, num_linear, tanh, matmul_dtype)

    def build(weight_pipeline_mode):
        in_specs = [pl.BlockSpec((block_batch, in_pad), lambda i: (i, 0))]
        for w, b in zip(wts, bs):
            if weight_pipeline_mode is None:
                in_specs.append(pl.BlockSpec(w.shape, lambda i: (0, 0)))
                in_specs.append(pl.BlockSpec(b.shape, lambda i: (0, 0)))
            else:
                in_specs.append(pl.BlockSpec(w.shape, lambda i: (0, 0),
                                             pipeline_mode=weight_pipeline_mode))
                in_specs.append(pl.BlockSpec(b.shape, lambda i: (0, 0),
                                             pipeline_mode=weight_pipeline_mode))
        out_specs = pl.BlockSpec((block_batch, out_pad), lambda i: (i, 0))
        return pl.pallas_call(
            kernel,
            out_shape=jax.ShapeDtypeStruct((b_pad_rows, out_pad), jnp.float32),
            grid_spec=pltpu.PrefetchScalarGridSpec(
                num_scalar_prefetch=0,
                grid=grid,
                in_specs=in_specs,
                out_specs=out_specs,
            ),
            compiler_params=pltpu.CompilerParams(
                dimension_semantics=("parallel",),
                vmem_limit_bytes=vmem_limit,
            ),
            cost_estimate=cost,
        )

    args = [x_p]
    for w, b in zip(wts, bs):
        args.append(w)
        args.append(b)

    try:
        # Weights/biases never change across the grid -> single-buffer them.
        out = build(pl.Buffered(1))(*args)
    except Exception:
        # Fallback for jax versions where Buffered(1) is not accepted on
        # pallas_call BlockSpecs; default (double) buffering is still correct.
        out = build(None)(*args)

    return out[:B, :out_size].astype(x.dtype)


def _reference_mlp(x, weights, biases, tanh):
    """Pure-JAX reference mirroring the PyTorch nn.Sequential."""
    h = jnp.asarray(x, jnp.float32)
    n = len(weights)
    for l, (w, b) in enumerate(zip(weights, biases)):
        h = h @ jnp.asarray(w, jnp.float32).T + jnp.asarray(b, jnp.float32)
        if l < n - 1:
            h = _leaky_relu(h)
    if tanh:
        h = jnp.tanh(h)
    return h


def _init_params(key, in_size, out_size, mlp_size, num_layers):
    """Deterministic synthetic parameters with the shapes nn.Linear implies."""
    dims = [in_size] + [mlp_size] * num_layers + [out_size]
    weights, biases = [], []
    for d_in, d_out in zip(dims[:-1], dims[1:]):
        key, kw, kb = jax.random.split(key, 3)
        bound = 1.0 / jnp.sqrt(d_in)
        weights.append(jax.random.uniform(kw, (d_out, d_in), jnp.float32,
                                          -bound, bound))
        biases.append(jax.random.uniform(kb, (d_out,), jnp.float32,
                                         -bound, bound))
    return weights, biases


if __name__ == "__main__":
    # ---- config 1: the small shipped shapes (single grid step, tanh head).
    in_size, out_size, mlp_size, num_layers, tanh = 6, 3, 32, 2, True
    batch = 16

    key = jax.random.PRNGKey(0)
    key, kx = jax.random.split(key)
    x = jax.random.normal(kx, (batch, in_size), jnp.float32)
    weights, biases = _init_params(key, in_size, out_size, mlp_size, num_layers)

    ref = _reference_mlp(x, weights, biases, tanh)

    # exact f32 MXU path
    out_f32 = jax.block_until_ready(
        mlp_forward(x, weights, biases, tanh=tanh, matmul_dtype=jnp.float32))
    assert out_f32.shape == (batch, out_size)
    assert jnp.allclose(out_f32, ref, atol=1e-5, rtol=1e-5), "f32 mismatch"

    # default bf16-input MXU path (v6e/v7x fast path, f32 accumulation)
    out_bf16 = jax.block_until_ready(
        mlp_forward(x, weights, biases, tanh=tanh))
    assert out_bf16.shape == (batch, out_size)
    assert jnp.allclose(out_bf16, ref, atol=3e-2, rtol=3e-2), "bf16 mismatch"

    # ---- config 2: non-aligned batch, multi-step grid, no tanh head.
    in2, out2, mlp2, layers2, tanh2, batch2 = 20, 10, 64, 3, False, 600
    key, kx2 = jax.random.split(key)
    x2 = jax.random.normal(kx2, (batch2, in2), jnp.float32)
    w2, b2 = _init_params(key, in2, out2, mlp2, layers2)

    ref2 = _reference_mlp(x2, w2, b2, tanh2)
    out2_f32 = jax.block_until_ready(
        mlp_forward(x2, w2, b2, tanh=tanh2, matmul_dtype=jnp.float32,
                    max_block_batch=512))
    assert out2_f32.shape == (batch2, out2)
    assert jnp.allclose(out2_f32, ref2, atol=1e-4, rtol=1e-4), "cfg2 mismatch"

    print("KERNEL_OK")
</pallas_src>

<mosaic_0001>
module attributes {stable_mosaic.version = 11 : i64} {
  func.func @_mlp_kernel(%arg0: i32, %arg1: memref<16x128xf32, #tpu.memory_space<vmem>>, %arg2: memref<128x128xf32, #tpu.memory_space<vmem>>, %arg3: memref<1x128xf32, #tpu.memory_space<vmem>>, %arg4: memref<128x128xf32, #tpu.memory_space<vmem>>, %arg5: memref<1x128xf32, #tpu.memory_space<vmem>>, %arg6: memref<128x128xf32, #tpu.memory_space<vmem>>, %arg7: memref<1x128xf32, #tpu.memory_space<vmem>>, %arg8: memref<16x128xf32, #tpu.memory_space<vmem>>) attributes {dimension_semantics = [#tpu.dimension_semantics<parallel>], iteration_bounds = array<i64: 1>, scalar_prefetch = 0 : i64, scratch_operands = 0 : i64, tpu.core_type = #tpu.core_type<tc>, window_params = [{transform_indices = @transform_0, window_bounds = array<i64: 16, 128>}, {pipeline_mode = #tpu.pipeline_mode<synchronous>, transform_indices = @transform_1, window_bounds = array<i64: 128, 128>}, {pipeline_mode = #tpu.pipeline_mode<synchronous>, transform_indices = @transform_2, window_bounds = array<i64: 1, 128>}, {pipeline_mode = #tpu.pipeline_mode<synchronous>, transform_indices = @transform_3, window_bounds = array<i64: 128, 128>}, {pipeline_mode = #tpu.pipeline_mode<synchronous>, transform_indices = @transform_4, window_bounds = array<i64: 1, 128>}, {pipeline_mode = #tpu.pipeline_mode<synchronous>, transform_indices = @transform_5, window_bounds = array<i64: 128, 128>}, {pipeline_mode = #tpu.pipeline_mode<synchronous>, transform_indices = @transform_6, window_bounds = array<i64: 1, 128>}, {transform_indices = @transform_7, window_bounds = array<i64: 16, 128>}]} {
    %c0 = arith.constant 0 : index
    %c0_0 = arith.constant 0 : index
    %0 = vector.load %arg1[%c0, %c0_0] : memref<16x128xf32, #tpu.memory_space<vmem>>, vector<16x128xf32>
    %c0_1 = arith.constant 0 : index
    %c0_2 = arith.constant 0 : index
    %1 = vector.load %arg2[%c0_1, %c0_2] : memref<128x128xf32, #tpu.memory_space<vmem>>, vector<128x128xf32>
    %c0_3 = arith.constant 0 : index
    %c0_4 = arith.constant 0 : index
    %2 = vector.load %arg3[%c0_3, %c0_4] : memref<1x128xf32, #tpu.memory_space<vmem>>, vector<1x128xf32>
    %cst = arith.constant dense<0.000000e+00> : vector<16x128xf32>
    %3 = tpu.matmul %0, %1, %cst {dimension_numbers = #tpu.dot_dimension_numbers<[1], [0], [0], [1], [0, 0, 1, 1], [], []>} : vector<16x128xf32>, vector<128x128xf32>, vector<16x128xf32> -> vector<16x128xf32>
    %4 = vector.broadcast %2 : vector<1x128xf32> to vector<16x128xf32>
    %5 = arith.addf %3, %4 : vector<16x128xf32>
    %cst_5 = arith.constant 0.000000e+00 : f32
    %6 = vector.broadcast %cst_5 : f32 to vector<16x128xf32>
    %7 = arith.cmpf oge, %5, %6 : vector<16x128xf32>
    %cst_6 = arith.constant 0.00999999977 : f32
    %8 = vector.broadcast %cst_6 : f32 to vector<16x128xf32>
    %9 = arith.mulf %8, %5 : vector<16x128xf32>
    %10 = arith.select %7, %5, %9 : vector<16x128xi1>, vector<16x128xf32>
    %c0_7 = arith.constant 0 : index
    %c0_8 = arith.constant 0 : index
    %11 = vector.load %arg4[%c0_7, %c0_8] : memref<128x128xf32, #tpu.memory_space<vmem>>, vector<128x128xf32>
    %c0_9 = arith.constant 0 : index
    %c0_10 = arith.constant 0 : index
    %12 = vector.load %arg5[%c0_9, %c0_10] : memref<1x128xf32, #tpu.memory_space<vmem>>, vector<1x128xf32>
    %cst_11 = arith.constant dense<0.000000e+00> : vector<16x128xf32>
    %13 = tpu.matmul %10, %11, %cst_11 {dimension_numbers = #tpu.dot_dimension_numbers<[1], [0], [0], [1], [0, 0, 1, 1], [], []>} : vector<16x128xf32>, vector<128x128xf32>, vector<16x128xf32> -> vector<16x128xf32>
    %14 = vector.broadcast %12 : vector<1x128xf32> to vector<16x128xf32>
    %15 = arith.addf %13, %14 : vector<16x128xf32>
    %cst_12 = arith.constant 0.000000e+00 : f32
    %16 = vector.broadcast %cst_12 : f32 to vector<16x128xf32>
    %17 = arith.cmpf oge, %15, %16 : vector<16x128xf32>
    %cst_13 = arith.constant 0.00999999977 : f32
    %18 = vector.broadcast %cst_13 : f32 to vector<16x128xf32>
    %19 = arith.mulf %18, %15 : vector<16x128xf32>
    %20 = arith.select %17, %15, %19 : vector<16x128xi1>, vector<16x128xf32>
    %c0_14 = arith.constant 0 : index
    %c0_15 = arith.constant 0 : index
    %21 = vector.load %arg6[%c0_14, %c0_15] : memref<128x128xf32, #tpu.memory_space<vmem>>, vector<128x128xf32>
    %c0_16 = arith.constant 0 : index
    %c0_17 = arith.constant 0 : index
    %22 = vector.load %arg7[%c0_16, %c0_17] : memref<1x128xf32, #tpu.memory_space<vmem>>, vector<1x128xf32>
    %cst_18 = arith.constant dense<0.000000e+00> : vector<16x128xf32>
    %23 = tpu.matmul %20, %21, %cst_18 {dimension_numbers = #tpu.dot_dimension_numbers<[1], [0], [0], [1], [0, 0, 1, 1], [], []>} : vector<16x128xf32>, vector<128x128xf32>, vector<16x128xf32> -> vector<16x128xf32>
    %24 = vector.broadcast %22 : vector<1x128xf32> to vector<16x128xf32>
    %25 = arith.addf %23, %24 : vector<16x128xf32>
    %26 = math.tanh %25 : vector<16x128xf32>
    %c0_19 = arith.constant 0 : index
    %c0_20 = arith.constant 0 : index
    %27 = vector.load %arg8[%c0_19, %c0_20] : memref<16x128xf32, #tpu.memory_space<vmem>>, vector<16x128xf32>
    tpu.vector_store %arg8[%c0_19, %c0_20], %26 {strides = array<i32>} : memref<16x128xf32, #tpu.memory_space<vmem>>, vector<16x128xf32>,
    return
  }
  func.func @transform_0(%arg0: i32) -> (i32, i32) {
    %c0_i32 = arith.constant 0 : i32
    %c0_i32_0 = arith.constant 0 : i32
    return %arg0, %c0_i32 : i32, i32
  }
  func.func @transform_1(%arg0: i32) -> (i32, i32) {
    %c0_i32 = arith.constant 0 : i32
    %c0_i32_0 = arith.constant 0 : i32
    %c0_i32_1 = arith.constant 0 : i32
    return %c0_i32, %c0_i32_0 : i32, i32
  }
  func.func @transform_2(%arg0: i32) -> (i32, i32) {
    %c0_i32 = arith.constant 0 : i32
    %c0_i32_0 = arith.constant 0 : i32
    %c0_i32_1 = arith.constant 0 : i32
    return %c0_i32, %c0_i32_0 : i32, i32
  }
  func.func @transform_3(%arg0: i32) -> (i32, i32) {
    %c0_i32 = arith.constant 0 : i32
    %c0_i32_0 = arith.constant 0 : i32
    %c0_i32_1 = arith.constant 0 : i32
    return %c0_i32, %c0_i32_0 : i32, i32
  }
  func.func @transform_4(%arg0: i32) -> (i32, i32) {
    %c0_i32 = arith.constant 0 : i32
    %c0_i32_0 = arith.constant 0 : i32
    %c0_i32_1 = arith.constant 0 : i32
    return %c0_i32, %c0_i32_0 : i32, i32
  }
  func.func @transform_5(%arg0: i32) -> (i32, i32) {
    %c0_i32 = arith.constant 0 : i32
    %c0_i32_0 = arith.constant 0 : i32
    %c0_i32_1 = arith.constant 0 : i32
    return %c0_i32, %c0_i32_0 : i32, i32
  }
  func.func @transform_6(%arg0: i32) -> (i32, i32) {
    %c0_i32 = arith.constant 0 : i32
    %c0_i32_0 = arith.constant 0 : i32
    %c0_i32_1 = arith.constant 0 : i32
    return %c0_i32, %c0_i32_0 : i32, i32
  }
  func.func @transform_7(%arg0: i32) -> (i32, i32) {
    %c0_i32 = arith.constant 0 : i32
    %c0_i32_0 = arith.constant 0 : i32
    return %arg0, %c0_i32 : i32, i32
  }
}

module attributes {stable_mosaic.version = 11 : i64} {
  func.func @_mlp_kernel(%arg0: i32, %arg1: memref<16x128xf32, #tpu.memory_space<vmem>>, %arg2: memref<128x128xf32, #tpu.memory_space<vmem>>, %arg3: memref<1x128xf32, #tpu.memory_space<vmem>>, %arg4: memref<128x128xf32, #tpu.memory_space<vmem>>, %arg5: memref<1x128xf32, #tpu.memory_space<vmem>>, %arg6: memref<128x128xf32, #tpu.memory_space<vmem>>, %arg7: memref<1x128xf32, #tpu.memory_space<vmem>>, %arg8: memref<16x128xf32, #tpu.memory_space<vmem>>) attributes {dimension_semantics = [#tpu.dimension_semantics<parallel>], iteration_bounds = array<i64: 1>, scalar_prefetch = 0 : i64, scratch_operands = 0 : i64, tpu.core_type = #tpu.core_type<tc>, window_params = [{transform_indices = @transform_0, window_bounds = array<i64: 16, 128>}, {pipeline_mode = #tpu.pipeline_mode<synchronous>, transform_indices = @transform_1, window_bounds = array<i64: 128, 128>}, {pipeline_mode = #tpu.pipeline_mode<synchronous>, transform_indices = @transform_2, window_bounds = array<i64: 1, 128>}, {pipeline_mode = #tpu.pipeline_mode<synchronous>, transform_indices = @transform_3, window_bounds = array<i64: 128, 128>}, {pipeline_mode = #tpu.pipeline_mode<synchronous>, transform_indices = @transform_4, window_bounds = array<i64: 1, 128>}, {pipeline_mode = #tpu.pipeline_mode<synchronous>, transform_indices = @transform_5, window_bounds = array<i64: 128, 128>}, {pipeline_mode = #tpu.pipeline_mode<synchronous>, transform_indices = @transform_6, window_bounds = array<i64: 1, 128>}, {transform_indices = @transform_7, window_bounds = array<i64: 16, 128>}]} {
    %c0 = arith.constant 0 : index
    %c0_0 = arith.constant 0 : index
    %0 = vector.load %arg1[%c0, %c0_0] : memref<16x128xf32, #tpu.memory_space<vmem>>, vector<16x128xf32>
    %c0_1 = arith.constant 0 : index
    %c0_2 = arith.constant 0 : index
    %1 = vector.load %arg2[%c0_1, %c0_2] : memref<128x128xf32, #tpu.memory_space<vmem>>, vector<128x128xf32>
    %c0_3 = arith.constant 0 : index
    %c0_4 = arith.constant 0 : index
    %2 = vector.load %arg3[%c0_3, %c0_4] : memref<1x128xf32, #tpu.memory_space<vmem>>, vector<1x128xf32>
    %cst = arith.constant dense<0.000000e+00> : vector<16x128xf32>
    %3 = tpu.matmul %0, %1, %cst {dimension_numbers = #tpu.dot_dimension_numbers<[1], [0], [0], [1], [0, 0, 1, 1], [], []>} : vector<16x128xf32>, vector<128x128xf32>, vector<16x128xf32> -> vector<16x128xf32>
    %4 = vector.broadcast %2 : vector<1x128xf32> to vector<16x128xf32>
    %5 = arith.addf %3, %4 : vector<16x128xf32>
    %cst_5 = arith.constant 0.000000e+00 : f32
    %6 = vector.broadcast %cst_5 : f32 to vector<16x128xf32>
    %7 = arith.cmpf oge, %5, %6 : vector<16x128xf32>
    %cst_6 = arith.constant 0.00999999977 : f32
    %8 = vector.broadcast %cst_6 : f32 to vector<16x128xf32>
    %9 = arith.mulf %8, %5 : vector<16x128xf32>
    %10 = arith.select %7, %5, %9 : vector<16x128xi1>, vector<16x128xf32>
    %c0_7 = arith.constant 0 : index
    %c0_8 = arith.constant 0 : index
    %11 = vector.load %arg4[%c0_7, %c0_8] : memref<128x128xf32, #tpu.memory_space<vmem>>, vector<128x128xf32>
    %c0_9 = arith.constant 0 : index
    %c0_10 = arith.constant 0 : index
    %12 = vector.load %arg5[%c0_9, %c0_10] : memref<1x128xf32, #tpu.memory_space<vmem>>, vector<1x128xf32>
    %cst_11 = arith.constant dense<0.000000e+00> : vector<16x128xf32>
    %13 = tpu.matmul %10, %11, %cst_11 {dimension_numbers = #tpu.dot_dimension_numbers<[1], [0], [0], [1], [0, 0, 1, 1], [], []>} : vector<16x128xf32>, vector<128x128xf32>, vector<16x128xf32> -> vector<16x128xf32>
    %14 = vector.broadcast %12 : vector<1x128xf32> to vector<16x128xf32>
    %15 = arith.addf %13, %14 : vector<16x128xf32>
    %cst_12 = arith.constant 0.000000e+00 : f32
    %16 = vector.broadcast %cst_12 : f32 to vector<16x128xf32>
    %17 = arith.cmpf oge, %15, %16 : vector<16x128xf32>
    %cst_13 = arith.constant 0.00999999977 : f32
    %18 = vector.broadcast %cst_13 : f32 to vector<16x128xf32>
    %19 = arith.mulf %18, %15 : vector<16x128xf32>
    %20 = arith.select %17, %15, %19 : vector<16x128xi1>, vector<16x128xf32>
    %c0_14 = arith.constant 0 : index
    %c0_15 = arith.constant 0 : index
    %21 = vector.load %arg6[%c0_14, %c0_15] : memref<128x128xf32, #tpu.memory_space<vmem>>, vector<128x128xf32>
    %c0_16 = arith.constant 0 : index
    %c0_17 = arith.constant 0 : index
    %22 = vector.load %arg7[%c0_16, %c0_17] : memref<1x128xf32, #tpu.memory_space<vmem>>, vector<1x128xf32>
    %cst_18 = arith.constant dense<0.000000e+00> : vector<16x128xf32>
    %23 = tpu.matmul %20, %21, %cst_18 {dimension_numbers = #tpu.dot_dimension_numbers<[1], [0], [0], [1], [0, 0, 1, 1], [], []>} : vector<16x128xf32>, vector<128x128xf32>, vector<16x128xf32> -> vector<16x128xf32>
    %24 = vector.broadcast %22 : vector<1x128xf32> to vector<16x128xf32>
    %25 = arith.addf %23, %24 : vector<16x128xf32>
    %26 = math.tanh %25 : vector<16x128xf32>
    %c0_19 = arith.constant 0 : index
    %c0_20 = arith.constant 0 : index
    %27 = vector.load %arg8[%c0_19, %c0_20] : memref<16x128xf32, #tpu.memory_space<vmem>>, vector<16x128xf32>
    tpu.vector_store %arg8[%c0_19, %c0_20], %26 {strides = array<i32>} : memref<16x128xf32, #tpu.memory_space<vmem>>, vector<16x128xf32>,
    return
  }
  func.func @transform_0(%arg0: i32) -> (i32, i32) {
    %c0_i32 = arith.constant 0 : i32
    %c0_i32_0 = arith.constant 0 : i32
    return %arg0, %c0_i32 : i32, i32
  }
  func.func @transform_1(%arg0: i32) -> (i32, i32) {
    %c0_i32 = arith.constant 0 : i32
    %c0_i32_0 = arith.constant 0 : i32
    %c0_i32_1 = arith.constant 0 : i32
    return %c0_i32, %c0_i32_0 : i32, i32
  }
  func.func @transform_2(%arg0: i32) -> (i32, i32) {
    %c0_i32 = arith.constant 0 : i32
    %c0_i32_0 = arith.constant 0 : i32
    %c0_i32_1 = arith.constant 0 : i32
    return %c0_i32, %c0_i32_0 : i32, i32
  }
  func.func @transform_3(%arg0: i32) -> (i32, i32) {
    %c0_i32 = arith.constant 0 : i32
    %c0_i32_0 = arith.constant 0 : i32
    %c0_i32_1 = arith.constant 0 : i32
    return %c0_i32, %c0_i32_0 : i32, i32
  }
  func.func @transform_4(%arg0: i32) -> (i32, i32) {
    %c0_i32 = arith.constant 0 : i32
    %c0_i32_0 = arith.constant 0 : i32
    %c0_i32_1 = arith.constant 0 : i32
    return %c0_i32, %c0_i32_0 : i32, i32
  }
  func.func @transform_5(%arg0: i32) -> (i32, i32) {
    %c0_i32 = arith.constant 0 : i32
    %c0_i32_0 = arith.constant 0 : i32
    %c0_i32_1 = arith.constant 0 : i32
    return %c0_i32, %c0_i32_0 : i32, i32
  }
  func.func @transform_6(%arg0: i32) -> (i32, i32) {
    %c0_i32 = arith.constant 0 : i32
    %c0_i32_0 = arith.constant 0 : i32
    %c0_i32_1 = arith.constant 0 : i32
    return %c0_i32, %c0_i32_0 : i32, i32
  }
  func.func @transform_7(%arg0: i32) -> (i32, i32) {
    %c0_i32 = arith.constant 0 : i32
    %c0_i32_0 = arith.constant 0 : i32
    return %arg0, %c0_i32 : i32, i32
  }
}

</mosaic_0001>

<bundles_post_ra>
// kernel: tpu_custom_call.1
= control target key start
LH: loop header
LB: loop body
LE: loop exit
PB: predicated region body
PF: predicated region fallthrough
CT: control target
= control target key end

     0   :  { %12 = vsyncpa [#allocation3], 0  ;;  %s945_s0 = inlined_call_operand.hbm [shape: f32[16,128], index: 0, kind: input, shape index: {}]   ;;  %s946_s1 = inlined_call_operand.hbm [shape: f32[128,128], index: 1, kind: input, shape index: {}]   ;;  %s947_s2 = inlined_call_operand.vmem [shape: f32[1,128], index: 2, kind: input, shape index: {}]   ;;  %s948_s3 = inlined_call_operand.hbm [shape: f32[128,128], index: 3, kind: input, shape index: {}]   ;;  %s949_s4 = inlined_call_operand.vmem [shape: f32[1,128], index: 4, kind: input, shape index: {}]   ;;  %s950_s5 = inlined_call_operand.hbm [shape: f32[128,128], index: 5, kind: input, shape index: {}]   ;;  %s951_s6 = inlined_call_operand.vmem [shape: f32[1,128], index: 6, kind: input, shape index: {}]   ;;  %s952_s7 = inlined_call_operand.hbm [shape: f32[16,128], index: 7, kind: output, shape index: {}]  }
   0x1   :  { %13 = vsyncpa [#allocation6], 0 }
   0x2   :  { %14 = vsyncpa [#allocation9], 0 }
   0x3   :  { %15 = vsyncpa [#allocation4], 0  ;;  %s800_s24 = smov [#allocation5]   ;;  %s801_s26 = smov [#allocation2]  }
   0x4   :  { %s33_s25 = sshll.u32 %s800_s24, 4  ;;  %s21_s27 = sshll.u32 %s801_s26, 4  ;;  %s34_s25 = int_to_ptr.vmem [resolvable:$true] %s33_s25  ;;  %s847_s27 = int_to_ptr.vmem [resolvable:$true] %s21_s27 }
   0x5   :  { %s682_s30 = scalar_lea.hbm %s946_s1, 2048 }
   0x6   :  { %p683_p0 = scmp.ne.s32.totalorder %s946_s1, %s682_s30  ;;  %p686_p1 = scmp.lt.u32.totalorder %s682_s30, %s946_s1 }
   0x8   :  { %p688_p2 = pnand %p686_p1, %p683_p0 }
   0xa   :  { %691 = shalt.err (!%p688_p2)
}
   0xb   :  { %s692_s12 = scalar_lea.vmem %s34_s25, 2048  ;;  %p697_p4 = scmp.lt.s32.totalorder %s34_s25, %s34_s25 }
   0xc   :  { %p693_p3 = scmp.ne.s32.totalorder %s34_s25, %s692_s12  ;;  %p698_p5 = scmp.lt.s32.totalorder %s692_s12, %s692_s12 }
   0xe   :  { %p699_p6 = por %p698_p5, %p697_p4 }
  0x10   :  { %p700_p7 = pnand %p699_p6, %p693_p3 }
  0x12   :  { %703 = shalt.err (!%p700_p7)
}
  0x13   :  { %s802_s13 = smov 128   ;;  %s803_s14 = smov 8  }
  0x14   :  { %39 = dma.hbm_to_vmem [thread:$0]  %s946_s1, 2048, %s34_s25, [#allocation6], %s802_s13, %s802_s13, %s803_s14  }
  0x15   :  { %s704_s19 = scalar_lea.hbm %s945_s0, 256 }
  0x16   :  { %p705_p8 = scmp.ne.s32.totalorder %s945_s0, %s704_s19  ;;  %p708_p9 = scmp.lt.u32.totalorder %s704_s19, %s945_s0 }
  0x18   :  { %p710_p10 = pnand %p708_p9, %p705_p8 }
  0x1a   :  { %713 = shalt.err (!%p710_p10)
}
  0x1b   :  { %s714_s24 = scalar_lea.vmem %s847_s27, 256  ;;  %p719_p12 = scmp.lt.s32.totalorder %s847_s27, %s847_s27 }
  0x1c   :  { %p715_p11 = scmp.ne.s32.totalorder %s847_s27, %s714_s24  ;;  %p720_p13 = scmp.lt.s32.totalorder %s714_s24, %s714_s24 }
  0x1e   :  { %p721_p0 = por %p720_p13, %p719_p12 }
  0x20   :  { %p722_p1 = pnand %p721_p0, %p715_p11 }
  0x22   :  { %725 = shalt.err (!%p722_p1)
}
  0x23   :  { %27 = dma.hbm_to_vmem [thread:$0]  %s945_s0, 256, %s847_s27, [#allocation3], %s802_s13, %s802_s13, %s803_s14  }
  0x24   :  { %s804_s26 = smov [#allocation7]   ;;  %s805_s29 = smov [#allocation8]  }
  0x25   :  { %s47_s28 = sshll.u32 %s804_s26, 4  ;;  %s61_s30 = sshll.u32 %s805_s29, 4  ;;  %s48_s28 = int_to_ptr.vmem [resolvable:$true] %s47_s28  ;;  %s884_s30 = int_to_ptr.vmem [resolvable:$true] %s61_s30 }
  0x26   :  { %s726_s10 = scalar_lea.hbm %s948_s3, 2048 }
  0x27   :  { %p727_p2 = scmp.ne.s32.totalorder %s948_s3, %s726_s10  ;;  %p730_p3 = scmp.lt.u32.totalorder %s726_s10, %s948_s3 }
  0x29   :  { %p732_p4 = pnand %p730_p3, %p727_p2 }
  0x2b   :  { %735 = shalt.err (!%p732_p4)
}
  0x2c   :  { %s736_s0 = scalar_lea.vmem %s48_s28, 2048  ;;  %p741_p6 = scmp.lt.s32.totalorder %s48_s28, %s48_s28 }
  0x2d   :  { %p737_p5 = scmp.ne.s32.totalorder %s48_s28, %s736_s0  ;;  %p742_p7 = scmp.lt.s32.totalorder %s736_s0, %s736_s0 }
  0x2f   :  { %p743_p8 = por %p742_p7, %p741_p6 }
  0x31   :  { %p744_p9 = pnand %p743_p8, %p737_p5 }
  0x33   :  { %747 = shalt.err (!%p744_p9)
}
  0x34   :  { %53 = dma.hbm_to_vmem [thread:$0]  %s948_s3, 2048, %s48_s28, [#allocation6], %s802_s13, %s802_s13, %s803_s14  }
  0x35   :  { %s748_s20 = scalar_lea.hbm %s950_s5, 2048 }
  0x36   :  { %p749_p10 = scmp.ne.s32.totalorder %s950_s5, %s748_s20  ;;  %p752_p11 = scmp.lt.u32.totalorder %s748_s20, %s950_s5 }
  0x38   :  { %p754_p12 = pnand %p752_p11, %p749_p10 }
  0x3a   :  { %757 = shalt.err (!%p754_p12)
}
  0x3b   :  { %s758_s1 = scalar_lea.vmem %s884_s30, 2048  ;;  %p763_p0 = scmp.lt.s32.totalorder %s884_s30, %s884_s30 }
  0x3c   :  { %p759_p13 = scmp.ne.s32.totalorder %s884_s30, %s758_s1  ;;  %p764_p1 = scmp.lt.s32.totalorder %s758_s1, %s758_s1 }
  0x3e   :  { %p765_p2 = por %p764_p1, %p763_p0 }
  0x40   :  { %p766_p3 = pnand %p765_p2, %p759_p13 }
  0x42   :  { %769 = shalt.err (!%p766_p3)
}
  0x43   :  { %67 = dma.hbm_to_vmem [thread:$0]  %s950_s5, 2048, %s884_s30, [#allocation9], %s802_s13, %s802_s13, %s803_s14  }
  0x44   :  { %792 = dma.done.wait [#allocation3], 256  }
  0x45   :  { %793 = vsyncadd [#allocation3], 4294967040 }
  0x46   :  { %794 = dma.done.wait [#allocation6], 4096  }
  0x47   :  { %795 = vsyncadd [#allocation6], 4294963200 }
  0x48   :  { %796 = dma.done.wait [#allocation9], 2048  }
  0x49   :  { %797 = vsyncadd [#allocation9], 4294965248  ;;  %v84_v0 = vld [vmem:[#allocation5] sm:$0xff]  ;;  %v85_v1 = vld [vmem:[#allocation5 + $0x8] sm:$0xff] }
  0x4a   :  { %v86_v2 = vld [vmem:[#allocation5 + $0x10] sm:$0xff]  ;;  %v575_v3 = vpack.c.bf16 %v85_v1, %v84_v0  ;;  %v87_v4 = vld [vmem:[#allocation5 + $0x18] sm:$0xff]  ;;  %v88_v6 = vld [vmem:[#allocation5 + $0x20] sm:$0xff] }
  0x4b   :  { %v579_v5 = vpack.c.bf16 %v87_v4, %v86_v2  ;;  %v89_v7 = vld [vmem:[#allocation5 + $0x28] sm:$0xff]  ;;  %v90_v9 = vld [vmem:[#allocation5 + $0x30] sm:$0xff]  ;;  %v91_v10 = vld [vmem:[#allocation5 + $0x38] sm:$0xff] }
  0x4c   :  { %576 = vmatprep.subr.bf16.mxu0 %v575_v3  ;;  %v583_v8 = vpack.c.bf16 %v89_v7, %v88_v6  ;;  %v82_v11 = vld [vmem:[#allocation2] sm:$0xff]  ;;  %v188_v12 = vld [vmem:[#allocation7] sm:$0xff]  ;;  %v189_v13 = vld [vmem:[#allocation7 + $0x8] sm:$0xff]  ;;  %v587_v20 = vpack.c.bf16 %v91_v10, %v90_v9 }
  0x4d   :  { %578 = vmatpush3.bf16.msra.mxu0 %v575_v3  ;;  %502 = vmatprep.mubr.f32.mxu0 %v82_v11  ;;  %v190_v14 = vld [vmem:[#allocation7 + $0x10] sm:$0xff]  ;;  %v607_v15 = vpack.c.bf16 %v189_v13, %v188_v12  ;;  %v191_v16 = vld [vmem:[#allocation7 + $0x18] sm:$0xff]  ;;  %v192_v18 = vld [vmem:[#allocation7 + $0x20] sm:$0xff] }
  0x4e   :  { %580 = vmatprep.subr.bf16.mxu0 %v579_v5  ;;  %v611_v17 = vpack.c.bf16 %v191_v16, %v190_v14  ;;  %v193_v19 = vld [vmem:[#allocation7 + $0x28] sm:$0xff]  ;;  %v92_v21 = vld [vmem:[#allocation5 + $0x40] sm:$0xff]  ;;  %v194_v24 = vld [vmem:[#allocation7 + $0x30] sm:$0xff] }
  0x4f   :  { %608 = vmatprep.subr.bf16.mxu1 %v607_v15  ;;  %v93_v22 = vld [vmem:[#allocation5 + $0x48] sm:$0xff]  ;;  %v615_v23 = vpack.c.bf16 %v193_v19, %v192_v18  ;;  %v195_v25 = vld [vmem:[#allocation7 + $0x38] sm:$0xff]  ;;  %v94_v27 = vld [vmem:[#allocation5 + $0x50] sm:$0xff] }
  0x50   :  { %610 = vmatpush3.bf16.msra.mxu1 %v607_v15  ;;  %v591_v26 = vpack.c.bf16 %v93_v22, %v92_v21  ;;  %v95_v28 = vld [vmem:[#allocation5 + $0x58] sm:$0xff]  ;;  %v619_v29 = vpack.c.bf16 %v195_v25, %v194_v24  ;;  %v196_v30 = vld [vmem:[#allocation7 + $0x40] sm:$0xff]  ;;  %v197_v31 = vld [vmem:[#allocation7 + $0x48] sm:$0xff] }
  0x51   :  { %582 = vmatpush3.bf16.msra.mxu0 %v579_v5  ;;  %612 = vmatprep.subr.bf16.mxu1 %v611_v17  ;;  %v595_v32 = vpack.c.bf16 %v95_v28, %v94_v27  ;;  %v96_v33 = vld [vmem:[#allocation5 + $0x60] sm:$0xff]  ;;  %v97_v34 = vld [vmem:[#allocation5 + $0x68] sm:$0xff]  ;;  %v623_v35 = vpack.c.bf16 %v197_v31, %v196_v30  ;;  %v198_v36 = vld [vmem:[#allocation7 + $0x50] sm:$0xff] }
  0x52   :  { %584 = vmatprep.subr.bf16.mxu0 %v583_v8  ;;  %v199_v37 = vld [vmem:[#allocation7 + $0x58] sm:$0xff]  ;;  %v599_v38 = vpack.c.bf16 %v97_v34, %v96_v33  ;;  %v98_v39 = vld [vmem:[#allocation5 + $0x70] sm:$0xff]  ;;  %v200_v44 = vld [vmem:[#allocation7 + $0x60] sm:$0xff] }
  0x53   :  { %v99_v40 = vld [vmem:[#allocation5 + $0x78] sm:$0xff]  ;;  %v627_v41 = vpack.c.bf16 %v199_v37, %v198_v36  ;;  %v201_v45 = vld [vmem:[#allocation7 + $0x68] sm:$0xff]  ;;  %v202_v47 = vld [vmem:[#allocation7 + $0x70] sm:$0xff] }
  0x54   :  { %614 = vmatpush3.bf16.msra.mxu1 %v611_v17  ;;  %v603_v42 = vpack.c.bf16 %v99_v40, %v98_v39  ;;  %v83_v43 = vld [vmem:[#allocation2 + $0x8] sm:$0xff]  ;;  %v631_v46 = vpack.c.bf16 %v201_v45, %v200_v44  ;;  %v292_v50 = vld [vmem:[#allocation8] sm:$0xff]  ;;  %v293_v51 = vld [vmem:[#allocation8 + $0x8] sm:$0xff] }
  0x55   :  { %586 = vmatpush3.bf16.msra.mxu0 %v583_v8  ;;  %616 = vmatprep.subr.bf16.mxu1 %v615_v23  ;;  %v203_v48 = vld [vmem:[#allocation7 + $0x78] sm:$0xff]  ;;  %v294_v52 = vld [vmem:[#allocation8 + $0x10] sm:$0xff]  ;;  %v639_v53 = vpack.c.bf16 %v293_v51, %v292_v50  ;;  %v296_v56 = vld [vmem:[#allocation8 + $0x20] sm:$0xff] }
  0x56   :  { %588 = vmatprep.subr.bf16.mxu0 %v587_v20  ;;  %v635_v49 = vpack.c.bf16 %v203_v48, %v202_v47  ;;  %v295_v54 = vld [vmem:[#allocation8 + $0x18] sm:$0xff]  ;;  %v297_v57 = vld [vmem:[#allocation8 + $0x28] sm:$0xff]  ;;  %v298_v59 = vld [vmem:[#allocation8 + $0x30] sm:$0xff] }
  0x57   :  { %v643_v55 = vpack.c.bf16 %v295_v54, %v294_v52  ;;  %v647_v58 = vpack.c.bf16 %v297_v57, %v296_v56  ;;  %v299_v60 = vld [vmem:[#allocation8 + $0x38] sm:$0xff]  ;;  %v300_v62 = vld [vmem:[#allocation8 + $0x40] sm:$0xff]  ;;  %v301_v63 = vld [vmem:[#allocation8 + $0x48] sm:$0xff] }
  0x58   :  { %618 = vmatpush3.bf16.msra.mxu1 %v615_v23  ;;  %v651_v61 = vpack.c.bf16 %v299_v60, %v298_v59  ;;  %v655_v0 = vpack.c.bf16 %v301_v63, %v300_v62  ;;  %v302_v1 = vld [vmem:[#allocation8 + $0x50] sm:$0xff]  ;;  %v303_v2 = vld [vmem:[#allocation8 + $0x58] sm:$0xff]  ;;  %v304_v13 = vld [vmem:[#allocation8 + $0x60] sm:$0xff] }
  0x59   :  { %590 = vmatpush3.bf16.msra.mxu0 %v587_v20  ;;  %620 = vmatprep.subr.bf16.mxu1 %v619_v29  ;;  %v659_v3 = vpack.c.bf16 %v303_v2, %v302_v1  ;;  %v413_v4 = vld [vmem:[%s947_s2] ss:$0 sm:$0xff]  ;;  %v305_v14 = vld [vmem:[#allocation8 + $0x68] sm:$0xff]  ;;  %v307_v17 = vld [vmem:[#allocation8 + $0x78] sm:$0xff] }
  0x5a   :  { %592 = vmatprep.subr.bf16.mxu0 %v591_v26  ;;  %v663_v15 = vpack.c.bf16 %v305_v14, %v304_v13  ;;  %v306_v16 = vld [vmem:[#allocation8 + $0x70] sm:$0xff] }
  0x5b   :  { %v667_v18 = vpack.c.bf16 %v307_v17, %v306_v16  ;;  %v414_v19 = vld [vmem:[%s949_s4] ss:$0 sm:$0xff]  ;;  %s806_s4 = smov [#allocation10]  }
  0x5c   :  { %622 = vmatpush3.bf16.msra.mxu1 %v619_v29  ;;  %v415_v28 = vld [vmem:[%s951_s6] ss:$0 sm:$0xff]  ;;  %s399_s8 = sshll.u32 %s806_s4, 4  ;;  %s400_s8 = int_to_ptr.vmem [resolvable:$true] %s399_s8 }
  0x5d   :  { %594 = vmatpush3.bf16.msra.mxu0 %v591_v26  ;;  %624 = vmatprep.subr.bf16.mxu1 %v623_v35  ;;  %s770_s9 = scalar_lea.vmem %s400_s8, 256  ;;  %p775_p5 = scmp.lt.s32.totalorder %s400_s8, %s400_s8 }
  0x5e   :  { %596 = vmatprep.subr.bf16.mxu0 %v595_v32  ;;  %p771_p4 = scmp.ne.s32.totalorder %s400_s8, %s770_s9  ;;  %p776_p6 = scmp.lt.s32.totalorder %s770_s9, %s770_s9 }
  0x60   :  { %626 = vmatpush3.bf16.msra.mxu1 %v623_v35  ;;  %p777_p7 = por %p776_p6, %p775_p5 }
  0x61   :  { %598 = vmatpush3.bf16.msra.mxu0 %v595_v32  ;;  %628 = vmatprep.subr.bf16.mxu1 %v627_v41 }
  0x62   :  { %600 = vmatprep.subr.bf16.mxu0 %v599_v38  ;;  %p778_p8 = pnand %p777_p7, %p771_p4 }
  0x64   :  { %630 = vmatpush3.bf16.msra.mxu1 %v627_v41 }
  0x65   :  { %602 = vmatpush3.bf16.msra.mxu0 %v599_v38  ;;  %632 = vmatprep.subr.bf16.mxu1 %v631_v46 }
  0x66   :  { %604 = vmatprep.subr.bf16.mxu0 %v603_v42 }
  0x68   :  { %634 = vmatpush3.bf16.msra.mxu1 %v631_v46 }
  0x69   :  { %606 = vmatpush3.bf16.msra.mxu0 %v603_v42  ;;  %636 = vmatprep.subr.bf16.mxu1 %v635_v49 }
  0x6a   :  { %640 = vmatprep.subr.bf16.mxu0 %v639_v53 }
  0x6c   :  { %503 = vmatmul.mubr.f32.vlgmr.msra.gmra.mrb[0].mxu0 %v83_v43  ;;  %638 = vmatpush3.bf16.msra.mxu1 %v635_v49 }
  0x6d   :  { %642 = vmatpush3.bf16.msra.mxu0 %v639_v53 }
  0x6e   :  { %644 = vmatprep.subr.bf16.mxu0 %v643_v55 }
  0x71   :  { %646 = vmatpush3.bf16.msra.mxu0 %v643_v55 }
  0x72   :  { %648 = vmatprep.subr.bf16.mxu0 %v647_v58 }
  0x75   :  { %650 = vmatpush3.bf16.msra.mxu0 %v647_v58 }
  0x76   :  { %652 = vmatprep.subr.bf16.mxu0 %v651_v61 }
  0x79   :  { %654 = vmatpush3.bf16.msra.mxu0 %v651_v61 }
  0x7a   :  { %656 = vmatprep.subr.bf16.mxu0 %v655_v0 }
  0x7d   :  { %658 = vmatpush3.bf16.msra.mxu0 %v655_v0 }
  0x7e   :  { %660 = vmatprep.subr.bf16.mxu0 %v659_v3 }
  0x81   :  { %662 = vmatpush3.bf16.msra.mxu0 %v659_v3 }
  0x82   :  { %664 = vmatprep.subr.bf16.mxu0 %v663_v15 }
  0x85   :  { %666 = vmatpush3.bf16.msra.mxu0 %v663_v15 }
  0x86   :  { %668 = vmatprep.subr.bf16.mxu0 %v667_v18 }
  0x89   :  { %670 = vmatpush3.bf16.msra.mxu0 %v667_v18 }
 0x13f   :  { %v504_v5 = vpop.f32.mrb[0].mxu0 }
 0x140   :  { %v179_v6 = vadd.f32 %v504_v5, %v413_v4  ;;  %v173_v7 = vpop.f32.mrb[1].mxu0 }
 0x141   :  { %v174_v8 = vadd.f32 %v413_v4, %v173_v7 }
 0x142   :  { %v185_v9 = vmul.f32 0.01, %v179_v6  ;;  %vm183_vm1 = vcmp.ge.f32.partialorder %v179_v6, 0.0 }
 0x143   :  { %vm182_vm0 = vcmp.ge.f32.partialorder %v174_v8, 0.0  ;;  %v184_v10 = vmul.f32 0.01, %v174_v8 }
 0x144   :  { %v187_v12 = vsel %vm183_vm1, %v179_v6, %v185_v9 }
 0x145   :  { %v186_v11 = vsel %vm182_vm0, %v174_v8, %v184_v10 }
 0x146   :  { %537 = vmatprep.mubr.f32.mxu1 %v186_v11 }
 0x147   :  { %538 = vmatmul.mubr.f32.vlgmr.msra.gmra.mrb[0].mxu1 %v187_v12 }
 0x21a   :  { %v539_v20 = vpop.f32.mrb[0].mxu1 }
 0x21b   :  { %v283_v21 = vadd.f32 %v539_v20, %v414_v19  ;;  %v277_v22 = vpop.f32.mrb[1].mxu1 }
 0x21c   :  { %v278_v23 = vadd.f32 %v414_v19, %v277_v22 }
 0x21d   :  { %v289_v24 = vmul.f32 0.01, %v283_v21  ;;  %vm287_vm2 = vcmp.ge.f32.partialorder %v283_v21, 0.0 }
 0x21e   :  { %v288_v25 = vmul.f32 0.01, %v278_v23  ;;  %vm286_vm3 = vcmp.ge.f32.partialorder %v278_v23, 0.0 }
 0x21f   :  { %v291_v27 = vsel %vm287_vm2, %v283_v21, %v289_v24 }
 0x220   :  { %v290_v26 = vsel %vm286_vm3, %v278_v23, %v288_v25 }
 0x221   :  { %572 = vmatprep.mubr.f32.mxu0 %v290_v26 }
 0x222   :  { %573 = vmatmul.mubr.f32.vlgmr.msra.gmra.mrb[2].mxu0 %v291_v27 }
 0x2f5   :  { %v574_v29 = vpop.f32.mrb[2].mxu0 }
 0x2f6   :  { %v387_v30 = vadd.f32 %v574_v29, %v415_v28  ;;  %v381_v31 = vpop.f32.mrb[3].mxu0 }
 0x2f7   :  { %v382_v32 = vadd.f32 %v415_v28, %v381_v31 }
 0x2f8   :  { %678 = vtanh.f32 %v387_v30 }
 0x2f9   :  { %680 = vtanh.f32 %v382_v32 }
 0x302   :  { %v679_v33 = vpop.eup %678 }
 0x303   :  { %v681_v34 = vpop.eup %680  ;;  %393 = vst [vmem:[#allocation10 + $0x8] sm:$0xff] %v679_v33 }
 0x304   :  { %392 = vst [vmem:[#allocation10] sm:$0xff] %v681_v34 }
 0x305   :  { %781 = shalt.err (!%p778_p8)
}
 0x306   :  { %s782_s11 = scalar_lea.hbm %s952_s7, 256 }
 0x307   :  { %p783_p9 = scmp.ne.s32.totalorder %s952_s7, %s782_s11  ;;  %p786_p10 = scmp.lt.u32.totalorder %s782_s11, %s952_s7 }
 0x309   :  { %p788_p11 = pnand %p786_p10, %p783_p9 }
 0x30b   :  { %791 = shalt.err (!%p788_p11)
}
 0x30c   :  { %405 = dma.vmem_to_hbm [thread:$0]  %s400_s8, 256, %s952_s7, [#allocation4], %s802_s13, %s802_s13, %s803_s14  }
 0x30d   :  { %798 = dma.done.wait [#allocation4], 256  }
 0x30e   :  { %799 = vsyncadd [#allocation4], 4294967040 }
 0x30f   :  { %409 = vsyncpa [#allocation3], 1 }
 0x310   :  { %410 = vsyncpa [#allocation6], 1 }
 0x311   :  { %411 = vsyncpa [#allocation9], 1 }
 0x312   :  { %412 = vsyncpa [#allocation4], 1 }

// kernel: tpu_custom_call.1
= control target key start
LH: loop header
LB: loop body
LE: loop exit
PB: predicated region body
PF: predicated region fallthrough
CT: control target
= control target key end

     0   :  { %12 = vsyncpa [#allocation3], 0  ;;  %s945_s0 = inlined_call_operand.hbm [shape: f32[16,128], index: 0, kind: input, shape index: {}]   ;;  %s946_s1 = inlined_call_operand.hbm [shape: f32[128,128], index: 1, kind: input, shape index: {}]   ;;  %s947_s2 = inlined_call_operand.vmem [shape: f32[1,128], index: 2, kind: input, shape index: {}]   ;;  %s948_s3 = inlined_call_operand.hbm [shape: f32[128,128], index: 3, kind: input, shape index: {}]   ;;  %s949_s4 = inlined_call_operand.vmem [shape: f32[1,128], index: 4, kind: input, shape index: {}]   ;;  %s950_s5 = inlined_call_operand.hbm [shape: f32[128,128], index: 5, kind: input, shape index: {}]   ;;  %s951_s6 = inlined_call_operand.vmem [shape: f32[1,128], index: 6, kind: input, shape index: {}]   ;;  %s952_s7 = inlined_call_operand.hbm [shape: f32[16,128], index: 7, kind: output, shape index: {}]  }
   0x1   :  { %13 = vsyncpa [#allocation6], 0 }
   0x2   :  { %14 = vsyncpa [#allocation9], 0 }
   0x3   :  { %15 = vsyncpa [#allocation4], 0  ;;  %s800_s24 = smov [#allocation5]   ;;  %s801_s26 = smov [#allocation2]  }
   0x4   :  { %s33_s25 = sshll.u32 %s800_s24, 4  ;;  %s21_s27 = sshll.u32 %s801_s26, 4  ;;  %s34_s25 = int_to_ptr.vmem [resolvable:$true] %s33_s25  ;;  %s847_s27 = int_to_ptr.vmem [resolvable:$true] %s21_s27 }
   0x5   :  { %s682_s30 = scalar_lea.hbm %s946_s1, 2048 }
   0x6   :  { %p683_p0 = scmp.ne.s32.totalorder %s946_s1, %s682_s30  ;;  %p686_p1 = scmp.lt.u32.totalorder %s682_s30, %s946_s1 }
   0x8   :  { %p688_p2 = pnand %p686_p1, %p683_p0 }
   0xa   :  { %691 = shalt.err (!%p688_p2)
}
   0xb   :  { %s692_s12 = scalar_lea.vmem %s34_s25, 2048  ;;  %p697_p4 = scmp.lt.s32.totalorder %s34_s25, %s34_s25 }
   0xc   :  { %p693_p3 = scmp.ne.s32.totalorder %s34_s25, %s692_s12  ;;  %p698_p5 = scmp.lt.s32.totalorder %s692_s12, %s692_s12 }
   0xe   :  { %p699_p6 = por %p698_p5, %p697_p4 }
  0x10   :  { %p700_p7 = pnand %p699_p6, %p693_p3 }
  0x12   :  { %703 = shalt.err (!%p700_p7)
}
  0x13   :  { %s802_s13 = smov 128   ;;  %s803_s14 = smov 8  }
  0x14   :  { %39 = dma.hbm_to_vmem [thread:$0]  %s946_s1, 2048, %s34_s25, [#allocation6], %s802_s13, %s802_s13, %s803_s14  }
  0x15   :  { %s704_s19 = scalar_lea.hbm %s945_s0, 256 }
  0x16   :  { %p705_p8 = scmp.ne.s32.totalorder %s945_s0, %s704_s19  ;;  %p708_p9 = scmp.lt.u32.totalorder %s704_s19, %s945_s0 }
  0x18   :  { %p710_p10 = pnand %p708_p9, %p705_p8 }
  0x1a   :  { %713 = shalt.err (!%p710_p10)
}
  0x1b   :  { %s714_s24 = scalar_lea.vmem %s847_s27, 256  ;;  %p719_p12 = scmp.lt.s32.totalorder %s847_s27, %s847_s27 }
  0x1c   :  { %p715_p11 = scmp.ne.s32.totalorder %s847_s27, %s714_s24  ;;  %p720_p13 = scmp.lt.s32.totalorder %s714_s24, %s714_s24 }
  0x1e   :  { %p721_p0 = por %p720_p13, %p719_p12 }
  0x20   :  { %p722_p1 = pnand %p721_p0, %p715_p11 }
  0x22   :  { %725 = shalt.err (!%p722_p1)
}
  0x23   :  { %27 = dma.hbm_to_vmem [thread:$0]  %s945_s0, 256, %s847_s27, [#allocation3], %s802_s13, %s802_s13, %s803_s14  }
  0x24   :  { %s804_s26 = smov [#allocation7]   ;;  %s805_s29 = smov [#allocation8]  }
  0x25   :  { %s47_s28 = sshll.u32 %s804_s26, 4  ;;  %s61_s30 = sshll.u32 %s805_s29, 4  ;;  %s48_s28 = int_to_ptr.vmem [resolvable:$true] %s47_s28  ;;  %s884_s30 = int_to_ptr.vmem [resolvable:$true] %s61_s30 }
  0x26   :  { %s726_s10 = scalar_lea.hbm %s948_s3, 2048 }
  0x27   :  { %p727_p2 = scmp.ne.s32.totalorder %s948_s3, %s726_s10  ;;  %p730_p3 = scmp.lt.u32.totalorder %s726_s10, %s948_s3 }
  0x29   :  { %p732_p4 = pnand %p730_p3, %p727_p2 }
  0x2b   :  { %735 = shalt.err (!%p732_p4)
}
  0x2c   :  { %s736_s0 = scalar_lea.vmem %s48_s28, 2048  ;;  %p741_p6 = scmp.lt.s32.totalorder %s48_s28, %s48_s28 }
  0x2d   :  { %p737_p5 = scmp.ne.s32.totalorder %s48_s28, %s736_s0  ;;  %p742_p7 = scmp.lt.s32.totalorder %s736_s0, %s736_s0 }
  0x2f   :  { %p743_p8 = por %p742_p7, %p741_p6 }
  0x31   :  { %p744_p9 = pnand %p743_p8, %p737_p5 }
  0x33   :  { %747 = shalt.err (!%p744_p9)
}
  0x34   :  { %53 = dma.hbm_to_vmem [thread:$0]  %s948_s3, 2048, %s48_s28, [#allocation6], %s802_s13, %s802_s13, %s803_s14  }
  0x35   :  { %s748_s20 = scalar_lea.hbm %s950_s5, 2048 }
  0x36   :  { %p749_p10 = scmp.ne.s32.totalorder %s950_s5, %s748_s20  ;;  %p752_p11 = scmp.lt.u32.totalorder %s748_s20, %s950_s5 }
  0x38   :  { %p754_p12 = pnand %p752_p11, %p749_p10 }
  0x3a   :  { %757 = shalt.err (!%p754_p12)
}
  0x3b   :  { %s758_s1 = scalar_lea.vmem %s884_s30, 2048  ;;  %p763_p0 = scmp.lt.s32.totalorder %s884_s30, %s884_s30 }
  0x3c   :  { %p759_p13 = scmp.ne.s32.totalorder %s884_s30, %s758_s1  ;;  %p764_p1 = scmp.lt.s32.totalorder %s758_s1, %s758_s1 }
  0x3e   :  { %p765_p2 = por %p764_p1, %p763_p0 }
  0x40   :  { %p766_p3 = pnand %p765_p2, %p759_p13 }
  0x42   :  { %769 = shalt.err (!%p766_p3)
}
  0x43   :  { %67 = dma.hbm_to_vmem [thread:$0]  %s950_s5, 2048, %s884_s30, [#allocation9], %s802_s13, %s802_s13, %s803_s14  }
  0x44   :  { %792 = dma.done.wait [#allocation3], 256  }
  0x45   :  { %793 = vsyncadd [#allocation3], 4294967040 }
  0x46   :  { %794 = dma.done.wait [#allocation6], 4096  }
  0x47   :  { %795 = vsyncadd [#allocation6], 4294963200 }
  0x48   :  { %796 = dma.done.wait [#allocation9], 2048  }
  0x49   :  { %797 = vsyncadd [#allocation9], 4294965248  ;;  %v84_v0 = vld [vmem:[#allocation5] sm:$0xff]  ;;  %v85_v1 = vld [vmem:[#allocation5 + $0x8] sm:$0xff] }
  0x4a   :  { %v86_v2 = vld [vmem:[#allocation5 + $0x10] sm:$0xff]  ;;  %v575_v3 = vpack.c.bf16 %v85_v1, %v84_v0  ;;  %v87_v4 = vld [vmem:[#allocation5 + $0x18] sm:$0xff]  ;;  %v88_v6 = vld [vmem:[#allocation5 + $0x20] sm:$0xff] }
  0x4b   :  { %v579_v5 = vpack.c.bf16 %v87_v4, %v86_v2  ;;  %v89_v7 = vld [vmem:[#allocation5 + $0x28] sm:$0xff]  ;;  %v90_v9 = vld [vmem:[#allocation5 + $0x30] sm:$0xff]  ;;  %v91_v10 = vld [vmem:[#allocation5 + $0x38] sm:$0xff] }
  0x4c   :  { %576 = vmatprep.subr.bf16.mxu0 %v575_v3  ;;  %v583_v8 = vpack.c.bf16 %v89_v7, %v88_v6  ;;  %v82_v11 = vld [vmem:[#allocation2] sm:$0xff]  ;;  %v188_v12 = vld [vmem:[#allocation7] sm:$0xff]  ;;  %v189_v13 = vld [vmem:[#allocation7 + $0x8] sm:$0xff]  ;;  %v587_v20 = vpack.c.bf16 %v91_v10, %v90_v9 }
  0x4d   :  { %578 = vmatpush3.bf16.msra.mxu0 %v575_v3  ;;  %502 = vmatprep.mubr.f32.mxu0 %v82_v11  ;;  %v190_v14 = vld [vmem:[#allocation7 + $0x10] sm:$0xff]  ;;  %v607_v15 = vpack.c.bf16 %v189_v13, %v188_v12  ;;  %v191_v16 = vld [vmem:[#allocation7 + $0x18] sm:$0xff]  ;;  %v192_v18 = vld [vmem:[#allocation7 + $0x20] sm:$0xff] }
  0x4e   :  { %580 = vmatprep.subr.bf16.mxu0 %v579_v5  ;;  %v611_v17 = vpack.c.bf16 %v191_v16, %v190_v14  ;;  %v193_v19 = vld [vmem:[#allocation7 + $0x28] sm:$0xff]  ;;  %v92_v21 = vld [vmem:[#allocation5 + $0x40] sm:$0xff]  ;;  %v194_v24 = vld [vmem:[#allocation7 + $0x30] sm:$0xff] }
  0x4f   :  { %608 = vmatprep.subr.bf16.mxu1 %v607_v15  ;;  %v93_v22 = vld [vmem:[#allocation5 + $0x48] sm:$0xff]  ;;  %v615_v23 = vpack.c.bf16 %v193_v19, %v192_v18  ;;  %v195_v25 = vld [vmem:[#allocation7 + $0x38] sm:$0xff]  ;;  %v94_v27 = vld [vmem:[#allocation5 + $0x50] sm:$0xff] }
  0x50   :  { %610 = vmatpush3.bf16.msra.mxu1 %v607_v15  ;;  %v591_v26 = vpack.c.bf16 %v93_v22, %v92_v21  ;;  %v95_v28 = vld [vmem:[#allocation5 + $0x58] sm:$0xff]  ;;  %v619_v29 = vpack.c.bf16 %v195_v25, %v194_v24  ;;  %v196_v30 = vld [vmem:[#allocation7 + $0x40] sm:$0xff]  ;;  %v197_v31 = vld [vmem:[#allocation7 + $0x48] sm:$0xff] }
  0x51   :  { %582 = vmatpush3.bf16.msra.mxu0 %v579_v5  ;;  %612 = vmatprep.subr.bf16.mxu1 %v611_v17  ;;  %v595_v32 = vpack.c.bf16 %v95_v28, %v94_v27  ;;  %v96_v33 = vld [vmem:[#allocation5 + $0x60] sm:$0xff]  ;;  %v97_v34 = vld [vmem:[#allocation5 + $0x68] sm:$0xff]  ;;  %v623_v35 = vpack.c.bf16 %v197_v31, %v196_v30  ;;  %v198_v36 = vld [vmem:[#allocation7 + $0x50] sm:$0xff] }
  0x52   :  { %584 = vmatprep.subr.bf16.mxu0 %v583_v8  ;;  %v199_v37 = vld [vmem:[#allocation7 + $0x58] sm:$0xff]  ;;  %v599_v38 = vpack.c.bf16 %v97_v34, %v96_v33  ;;  %v98_v39 = vld [vmem:[#allocation5 + $0x70] sm:$0xff]  ;;  %v200_v44 = vld [vmem:[#allocation7 + $0x60] sm:$0xff] }
  0x53   :  { %v99_v40 = vld [vmem:[#allocation5 + $0x78] sm:$0xff]  ;;  %v627_v41 = vpack.c.bf16 %v199_v37, %v198_v36  ;;  %v201_v45 = vld [vmem:[#allocation7 + $0x68] sm:$0xff]  ;;  %v202_v47 = vld [vmem:[#allocation7 + $0x70] sm:$0xff] }
  0x54   :  { %614 = vmatpush3.bf16.msra.mxu1 %v611_v17  ;;  %v603_v42 = vpack.c.bf16 %v99_v40, %v98_v39  ;;  %v83_v43 = vld [vmem:[#allocation2 + $0x8] sm:$0xff]  ;;  %v631_v46 = vpack.c.bf16 %v201_v45, %v200_v44  ;;  %v292_v50 = vld [vmem:[#allocation8] sm:$0xff]  ;;  %v293_v51 = vld [vmem:[#allocation8 + $0x8] sm:$0xff] }
  0x55   :  { %586 = vmatpush3.bf16.msra.mxu0 %v583_v8  ;;  %616 = vmatprep.subr.bf16.mxu1 %v615_v23  ;;  %v203_v48 = vld [vmem:[#allocation7 + $0x78] sm:$0xff]  ;;  %v294_v52 = vld [vmem:[#allocation8 + $0x10] sm:$0xff]  ;;  %v639_v53 = vpack.c.bf16 %v293_v51, %v292_v50  ;;  %v296_v56 = vld [vmem:[#allocation8 + $0x20] sm:$0xff] }
  0x56   :  { %588 = vmatprep.subr.bf16.mxu0 %v587_v20  ;;  %v635_v49 = vpack.c.bf16 %v203_v48, %v202_v47  ;;  %v295_v54 = vld [vmem:[#allocation8 + $0x18] sm:$0xff]  ;;  %v297_v57 = vld [vmem:[#allocation8 + $0x28] sm:$0xff]  ;;  %v298_v59 = vld [vmem:[#allocation8 + $0x30] sm:$0xff] }
  0x57   :  { %v643_v55 = vpack.c.bf16 %v295_v54, %v294_v52  ;;  %v647_v58 = vpack.c.bf16 %v297_v57, %v296_v56  ;;  %v299_v60 = vld [vmem:[#allocation8 + $0x38] sm:$0xff]  ;;  %v300_v62 = vld [vmem:[#allocation8 + $0x40] sm:$0xff]  ;;  %v301_v63 = vld [vmem:[#allocation8 + $0x48] sm:$0xff] }
  0x58   :  { %618 = vmatpush3.bf16.msra.mxu1 %v615_v23  ;;  %v651_v61 = vpack.c.bf16 %v299_v60, %v298_v59  ;;  %v655_v0 = vpack.c.bf16 %v301_v63, %v300_v62  ;;  %v302_v1 = vld [vmem:[#allocation8 + $0x50] sm:$0xff]  ;;  %v303_v2 = vld [vmem:[#allocation8 + $0x58] sm:$0xff]  ;;  %v304_v13 = vld [vmem:[#allocation8 + $0x60] sm:$0xff] }
  0x59   :  { %590 = vmatpush3.bf16.msra.mxu0 %v587_v20  ;;  %620 = vmatprep.subr.bf16.mxu1 %v619_v29  ;;  %v659_v3 = vpack.c.bf16 %v303_v2, %v302_v1  ;;  %v413_v4 = vld [vmem:[%s947_s2] ss:$0 sm:$0xff]  ;;  %v305_v14 = vld [vmem:[#allocation8 + $0x68] sm:$0xff]  ;;  %v307_v17 = vld [vmem:[#allocation8 + $0x78] sm:$0xff] }
  0x5a   :  { %592 = vmatprep.subr.bf16.mxu0 %v591_v26  ;;  %v663_v15 = vpack.c.bf16 %v305_v14, %v304_v13  ;;  %v306_v16 = vld [vmem:[#allocation8 + $0x70] sm:$0xff] }
  0x5b   :  { %v667_v18 = vpack.c.bf16 %v307_v17, %v306_v16  ;;  %v414_v19 = vld [vmem:[%s949_s4] ss:$0 sm:$0xff]  ;;  %s806_s4 = smov [#allocation10]  }
  0x5c   :  { %622 = vmatpush3.bf16.msra.mxu1 %v619_v29  ;;  %v415_v28 = vld [vmem:[%s951_s6] ss:$0 sm:$0xff]  ;;  %s399_s8 = sshll.u32 %s806_s4, 4  ;;  %s400_s8 = int_to_ptr.vmem [resolvable:$true] %s399_s8 }
  0x5d   :  { %594 = vmatpush3.bf16.msra.mxu0 %v591_v26  ;;  %624 = vmatprep.subr.bf16.mxu1 %v623_v35  ;;  %s770_s9 = scalar_lea.vmem %s400_s8, 256  ;;  %p775_p5 = scmp.lt.s32.totalorder %s400_s8, %s400_s8 }
  0x5e   :  { %596 = vmatprep.subr.bf16.mxu0 %v595_v32  ;;  %p771_p4 = scmp.ne.s32.totalorder %s400_s8, %s770_s9  ;;  %p776_p6 = scmp.lt.s32.totalorder %s770_s9, %s770_s9 }
  0x60   :  { %626 = vmatpush3.bf16.msra.mxu1 %v623_v35  ;;  %p777_p7 = por %p776_p6, %p775_p5 }
  0x61   :  { %598 = vmatpush3.bf16.msra.mxu0 %v595_v32  ;;  %628 = vmatprep.subr.bf16.mxu1 %v627_v41 }
  0x62   :  { %600 = vmatprep.subr.bf16.mxu0 %v599_v38  ;;  %p778_p8 = pnand %p777_p7, %p771_p4 }
  0x64   :  { %630 = vmatpush3.bf16.msra.mxu1 %v627_v41 }
  0x65   :  { %602 = vmatpush3.bf16.msra.mxu0 %v599_v38  ;;  %632 = vmatprep.subr.bf16.mxu1 %v631_v46 }
  0x66   :  { %604 = vmatprep.subr.bf16.mxu0 %v603_v42 }
  0x68   :  { %634 = vmatpush3.bf16.msra.mxu1 %v631_v46 }
  0x69   :  { %606 = vmatpush3.bf16.msra.mxu0 %v603_v42  ;;  %636 = vmatprep.subr.bf16.mxu1 %v635_v49 }
  0x6a   :  { %640 = vmatprep.subr.bf16.mxu0 %v639_v53 }
  0x6c   :  { %503 = vmatmul.mubr.f32.vlgmr.msra.gmra.mrb[0].mxu0 %v83_v43  ;;  %638 = vmatpush3.bf16.msra.mxu1 %v635_v49 }
  0x6d   :  { %642 = vmatpush3.bf16.msra.mxu0 %v639_v53 }
  0x6e   :  { %644 = vmatprep.subr.bf16.mxu0 %v643_v55 }
  0x71   :  { %646 = vmatpush3.bf16.msra.mxu0 %v643_v55 }
  0x72   :  { %648 = vmatprep.subr.bf16.mxu0 %v647_v58 }
  0x75   :  { %650 = vmatpush3.bf16.msra.mxu0 %v647_v58 }
  0x76   :  { %652 = vmatprep.subr.bf16.mxu0 %v651_v61 }
  0x79   :  { %654 = vmatpush3.bf16.msra.mxu0 %v651_v61 }
  0x7a   :  { %656 = vmatprep.subr.bf16.mxu0 %v655_v0 }
  0x7d   :  { %658 = vmatpush3.bf16.msra.mxu0 %v655_v0 }
  0x7e   :  { %660 = vmatprep.subr.bf16.mxu0 %v659_v3 }
  0x81   :  { %662 = vmatpush3.bf16.msra.mxu0 %v659_v3 }
  0x82   :  { %664 = vmatprep.subr.bf16.mxu0 %v663_v15 }
  0x85   :  { %666 = vmatpush3.bf16.msra.mxu0 %v663_v15 }
  0x86   :  { %668 = vmatprep.subr.bf16.mxu0 %v667_v18 }
  0x89   :  { %670 = vmatpush3.bf16.msra.mxu0 %v667_v18 }
 0x13f   :  { %v504_v5 = vpop.f32.mrb[0].mxu0 }
 0x140   :  { %v179_v6 = vadd.f32 %v504_v5, %v413_v4  ;;  %v173_v7 = vpop.f32.mrb[1].mxu0 }
 0x141   :  { %v174_v8 = vadd.f32 %v413_v4, %v173_v7 }
 0x142   :  { %v185_v9 = vmul.f32 0.01, %v179_v6  ;;  %vm183_vm1 = vcmp.ge.f32.partialorder %v179_v6, 0.0 }
 0x143   :  { %vm182_vm0 = vcmp.ge.f32.partialorder %v174_v8, 0.0  ;;  %v184_v10 = vmul.f32 0.01, %v174_v8 }
 0x144   :  { %v187_v12 = vsel %vm183_vm1, %v179_v6, %v185_v9 }
 0x145   :  { %v186_v11 = vsel %vm182_vm0, %v174_v8, %v184_v10 }
 0x146   :  { %537 = vmatprep.mubr.f32.mxu1 %v186_v11 }
 0x147   :  { %538 = vmatmul.mubr.f32.vlgmr.msra.gmra.mrb[0].mxu1 %v187_v12 }
 0x21a   :  { %v539_v20 = vpop.f32.mrb[0].mxu1 }
 0x21b   :  { %v283_v21 = vadd.f32 %v539_v20, %v414_v19  ;;  %v277_v22 = vpop.f32.mrb[1].mxu1 }
 0x21c   :  { %v278_v23 = vadd.f32 %v414_v19, %v277_v22 }
 0x21d   :  { %v289_v24 = vmul.f32 0.01, %v283_v21  ;;  %vm287_vm2 = vcmp.ge.f32.partialorder %v283_v21, 0.0 }
 0x21e   :  { %v288_v25 = vmul.f32 0.01, %v278_v23  ;;  %vm286_vm3 = vcmp.ge.f32.partialorder %v278_v23, 0.0 }
 0x21f   :  { %v291_v27 = vsel %vm287_vm2, %v283_v21, %v289_v24 }
 0x220   :  { %v290_v26 = vsel %vm286_vm3, %v278_v23, %v288_v25 }
 0x221   :  { %572 = vmatprep.mubr.f32.mxu0 %v290_v26 }
 0x222   :  { %573 = vmatmul.mubr.f32.vlgmr.msra.gmra.mrb[2].mxu0 %v291_v27 }
 0x2f5   :  { %v574_v29 = vpop.f32.mrb[2].mxu0 }
 0x2f6   :  { %v387_v30 = vadd.f32 %v574_v29, %v415_v28  ;;  %v381_v31 = vpop.f32.mrb[3].mxu0 }
 0x2f7   :  { %v382_v32 = vadd.f32 %v415_v28, %v381_v31 }
 0x2f8   :  { %678 = vtanh.f32 %v387_v30 }
 0x2f9   :  { %680 = vtanh.f32 %v382_v32 }
 0x302   :  { %v679_v33 = vpop.eup %678 }
 0x303   :  { %v681_v34 = vpop.eup %680  ;;  %393 = vst [vmem:[#allocation10 + $0x8] sm:$0xff] %v679_v33 }
 0x304   :  { %392 = vst [vmem:[#allocation10] sm:$0xff] %v681_v34 }
 0x305   :  { %781 = shalt.err (!%p778_p8)
}
 0x306   :  { %s782_s11 = scalar_lea.hbm %s952_s7, 256 }
 0x307   :  { %p783_p9 = scmp.ne.s32.totalorder %s952_s7, %s782_s11  ;;  %p786_p10 = scmp.lt.u32.totalorder %s782_s11, %s952_s7 }
 0x309   :  { %p788_p11 = pnand %p786_p10, %p783_p9 }
 0x30b   :  { %791 = shalt.err (!%p788_p11)
}
 0x30c   :  { %405 = dma.vmem_to_hbm [thread:$0]  %s400_s8, 256, %s952_s7, [#allocation4], %s802_s13, %s802_s13, %s803_s14  }
 0x30d   :  { %798 = dma.done.wait [#allocation4], 256  }
 0x30e   :  { %799 = vsyncadd [#allocation4], 4294967040 }
 0x30f   :  { %409 = vsyncpa [#allocation3], 1 }
 0x310   :  { %410 = vsyncpa [#allocation6], 1 }
 0x311   :  { %411 = vsyncpa [#allocation9], 1 }
 0x312   :  { %412 = vsyncpa [#allocation4], 1 }

</bundles_post_ra>
